<compile_context>
chip_gen: v5e
topology: v5e:2x2
jax: 0.10.0
libtpu: 0.0.40
codegen_flags: <defaults>
</compile_context>

<pallas_src>
import functools

import jax
import jax.numpy as jnp
import numpy as np
from jax.experimental import pallas as pl
from jax.experimental.pallas import tpu as pltpu


def _round_up(x, m):
    return (x + m - 1) // m * m


# ---------------------------------------------------------------------------
# Pallas kernel: one layer = GCN (row tile of A) + 2-step LSTM (+ optional
# fused pad mask in the epilogue).
# ---------------------------------------------------------------------------
def gcn_lstm_layer_kernel(*refs, tile_n, hp, apply_mask, compute_dtype):
    if apply_mask:
        (x_ref, a_ref, w_ref, b_ref, wih_igo_ref, wcat_ref, bl_ref,
         bl_igo_ref, mask_ref, out_ref) = refs
    else:
        (x_ref, a_ref, w_ref, b_ref, wih_igo_ref, wcat_ref, bl_ref,
         bl_igo_ref, out_ref) = refs
        mask_ref = None

    cd = compute_dtype
    row0 = pl.multiple_of(pl.program_id(0) * tile_n, tile_n)

    x_full = x_ref[...]                              # [Np, Hp] resident (1 buf)
    x0 = x_ref[pl.ds(row0, tile_n), :]               # this tile's rows
    a_rows = a_ref[...]                              # [tile_n, Np] streamed

    # ---- GCN: (A[rows,:] @ X) @ W + b  (no per-tile recompute of X@W) ----
    ax = jnp.dot(a_rows.astype(cd), x_full.astype(cd),
                 preferred_element_type=jnp.float32)                 # [tile,Hp]
    x_mid = jnp.dot(ax.astype(cd), w_ref[...].astype(cd),
                    preferred_element_type=jnp.float32) + b_ref[...]

    # ---- LSTM over length-2 sequence [x0, x_mid], zero initial state ----
    # Step 1 specialized for h=c=0: no h@W_hh, the f gate is dropped, and only
    # the i/g/o columns of W_ih ([Hp, 3Hp]) are multiplied.  Bias broadcast is
    # implicit (no materialized [tile_n, kHp] slab).
    g0 = jnp.dot(x0.astype(cd), wih_igo_ref[...].astype(cd),
                 preferred_element_type=jnp.float32) + bl_igo_ref[...]
    i0 = jax.nn.sigmoid(g0[:, 0:hp])
    gg0 = jnp.tanh(g0[:, hp:2 * hp])
    o0 = jax.nn.sigmoid(g0[:, 2 * hp:3 * hp])
    c1 = i0 * gg0
    h1 = o0 * jnp.tanh(c1)

    # Step 2: one K=2*Hp matmul (concat is lane-aligned since Hp % 128 == 0).
    xh = jnp.concatenate([x_mid.astype(cd), h1.astype(cd)], axis=-1)
    g1 = jnp.dot(xh, wcat_ref[...].astype(cd),
                 preferred_element_type=jnp.float32) + bl_ref[...]
    i1 = jax.nn.sigmoid(g1[:, 0:hp])
    f1 = jax.nn.sigmoid(g1[:, hp:2 * hp])
    gg1 = jnp.tanh(g1[:, 2 * hp:3 * hp])
    o1 = jax.nn.sigmoid(g1[:, 3 * hp:4 * hp])
    c2 = f1 * c1 + i1 * gg1
    h2 = o1 * jnp.tanh(c2)

    if apply_mask:
        m = mask_ref[...]                            # [tile_n, 128] lane slab
        if hp > 128:
            m = jnp.tile(m, (1, hp // 128))
        h2 = h2 * m
    out_ref[...] = h2.astype(out_ref.dtype)


def _const_spec(shape):
    """Constant-index block: fetched once, so request a single buffer (frees
    VMEM for the streamed A slab).  Falls back cleanly if the running JAX
    version's BlockSpec has no pipeline_mode kwarg."""
    try:
        return pl.BlockSpec(shape, lambda i: (0, 0),
                            pipeline_mode=pl.Buffered(1))
    except TypeError:
        return pl.BlockSpec(shape, lambda i: (0, 0))


def _layer_call(x_p, a_p, w_p, b_p, wih_igo_p, wcat_p, bl_p, bl_igo_p, mask_p,
                *, tile_n, apply_mask, compute_dtype, out_dtype, vmem_limit):
    Np, Hp = x_p.shape
    assert Np % tile_n == 0, (Np, tile_n)
    grid = (Np // tile_n,)

    rowt = lambda shape: pl.BlockSpec(shape, lambda i: (i, 0))

    in_specs = [
        _const_spec((Np, Hp)),           # X (full, resident, single buffered)
        rowt((tile_n, Np)),              # A row slab (the streamed input)
        _const_spec((Hp, Hp)),           # GCN weight
        _const_spec((1, Hp)),            # GCN bias
        _const_spec((Hp, 3 * Hp)),       # LSTM W_ih, i/g/o columns only
        _const_spec((2 * Hp, 4 * Hp)),   # LSTM [W_ih; W_hh] stacked on K
        _const_spec((1, 4 * Hp)),        # LSTM bias (b_ih + b_hh)
        _const_spec((1, 3 * Hp)),        # LSTM bias, i/g/o slice
    ]
    args = [x_p, a_p, w_p, b_p, wih_igo_p, wcat_p, bl_p, bl_igo_p]
    if apply_mask:
        in_specs.append(rowt((tile_n, 128)))         # lane-dense pad-mask slab
        args.append(mask_p)

    kernel = functools.partial(
        gcn_lstm_layer_kernel, tile_n=tile_n, hp=Hp,
        apply_mask=apply_mask, compute_dtype=compute_dtype)

    return pl.pallas_call(
        kernel,
        out_shape=jax.ShapeDtypeStruct((Np, Hp), out_dtype),
        grid=grid,
        in_specs=in_specs,
        out_specs=rowt((tile_n, Hp)),
        compiler_params=pltpu.CompilerParams(
            dimension_semantics=("parallel",),       # megacore on v7x
            vmem_limit_bytes=vmem_limit),
    )(*args)


# ---------------------------------------------------------------------------
# Padding helpers (lane-pad H -> Hp, sublane-pad N -> Np).  LSTM weights are
# padded per-gate so the i/f/g/o blocks stay at k*Hp offsets.
# ---------------------------------------------------------------------------
def _pad2(a, rows, cols):
    return jnp.pad(a, ((0, rows - a.shape[0]), (0, cols - a.shape[1])))


def _pad_gate_mat(w, H, Hp):          # [H, 4H] -> [Hp, 4Hp]
    gates = [_pad2(w[:, k * H:(k + 1) * H], Hp, Hp) for k in range(4)]
    return jnp.concatenate(gates, axis=1)


def _pad_gate_vec(b, H, Hp):          # [1, 4H] -> [1, 4Hp]
    gates = [jnp.pad(b[:, k * H:(k + 1) * H], ((0, 0), (0, Hp - H)))
             for k in range(4)]
    return jnp.concatenate(gates, axis=1)


def graph_encoder_pallas(x, A, params, mask_pad, *, tile_n=256,
                         compute_dtype=jnp.float32):
    """x: [N, H] node features, A: [N, N] normalized adjacency,
    mask_pad: [B, S, 1] with N == B*S.  Returns [B, S, H].

    On v6e/v7x pass compute_dtype=jnp.bfloat16 at realistic sizes: A and the
    inter-layer x1 are then STORED bf16 in HBM (halving the dominant traffic)
    while accumulation stays f32.  On v5e keep tile_n large; bandwidth is the
    bottleneck there too."""
    N, H = x.shape
    B, S = mask_pad.shape[0], mask_pad.shape[1]
    Hp = _round_up(max(H, 128), 128)

    # Row-tile size: multiple of 8, no larger than needed, and reduced until
    # the row grid has >= 2 steps so v7x's two TensorCores both get work.
    tile_n = max(8, min(_round_up(tile_n, 8), _round_up(N, 8)))
    while tile_n > 8:
        if _round_up(N, tile_n) // tile_n >= 2:
            break
        tile_n = max(8, (tile_n // 2) // 8 * 8)
    Np = _round_up(max(N, tile_n), tile_n)

    storage_dtype = jnp.dtype(compute_dtype)   # HBM storage for A / x / x1

    x_p = _pad2(x, Np, Hp).astype(storage_dtype)
    A_p = _pad2(A, Np, Np).astype(storage_dtype)
    w1_p = _pad2(params["w1"], Hp, Hp)
    b1_p = jnp.pad(params["b1"], ((0, 0), (0, Hp - H)))
    w2_p = _pad2(params["w2"], Hp, Hp)
    b2_p = jnp.pad(params["b2"], ((0, 0), (0, Hp - H)))
    wih_p = _pad_gate_mat(params["wih"], H, Hp)           # [Hp, 4Hp]
    whh_p = _pad_gate_mat(params["whh"], H, Hp)           # [Hp, 4Hp]
    wcat_p = jnp.concatenate([wih_p, whh_p], axis=0)      # [2Hp, 4Hp]
    bl_p = _pad_gate_vec(params["blstm"], H, Hp)          # [1, 4Hp]
    # i/g/o-only slices for the specialized (zero-state) first LSTM step.
    wih_igo_p = jnp.concatenate(
        [wih_p[:, 0:Hp], wih_p[:, 2 * Hp:3 * Hp], wih_p[:, 3 * Hp:4 * Hp]],
        axis=1)                                           # [Hp, 3Hp]
    bl_igo_p = jnp.concatenate(
        [bl_p[:, 0:Hp], bl_p[:, 2 * Hp:3 * Hp], bl_p[:, 3 * Hp:4 * Hp]],
        axis=1)                                           # [1, 3Hp]

    # Lane-dense pad mask as a single 128-lane slab: [B,S,1] -> [Np, 128].
    mask_flat = mask_pad.reshape(N, 1).astype(jnp.float32)
    mask_p = _pad2(jnp.broadcast_to(mask_flat, (N, 128)), Np, 128)

    # VMEM budget: constants single-buffered, A slab + output double-buffered,
    # plus a rough allowance for in-kernel intermediates.  Clamp to the
    # physical capacity of *this* chip minus 16 MiB of headroom for Mosaic
    # internal scratch (so v5e/v6e can go well past 64 MiB, v7x never over-asks).
    sb = jnp.dtype(storage_dtype).itemsize
    f32b = 4
    est = (sb * Np * Hp
           + sb * 2 * tile_n * Np
           + f32b * (Hp * Hp + Hp)
           + f32b * (3 * Hp * Hp + 8 * Hp * Hp + 7 * Hp)
           + f32b * 2 * tile_n * Hp
           + f32b * 2 * tile_n * 128
           + f32b * tile_n * (Np + 12 * Hp))
    try:
        vmem_cap = int(pltpu.get_tpu_info().vmem_capacity_bytes)
    except Exception:
        vmem_cap = 64 << 20       # conservative: smallest (v7x) physical VMEM
    vmem_limit = int(min(max(int(1.5 * est), 32 << 20),
                         max(vmem_cap - (16 << 20), 32 << 20)))

    common = dict(tile_n=tile_n, compute_dtype=compute_dtype,
                  vmem_limit=vmem_limit)
    # Layer 1: GCN1 + LSTM (no mask); x1 round-trips HBM in storage_dtype.
    x1_p = _layer_call(x_p, A_p, w1_p, b1_p, wih_igo_p, wcat_p, bl_p, bl_igo_p,
                       None, apply_mask=False, out_dtype=storage_dtype,
                       **common)
    # Layer 2: GCN2 + LSTM + fused pad mask; final output in f32.
    x2_p = _layer_call(x1_p, A_p, w2_p, b2_p, wih_igo_p, wcat_p, bl_p,
                       bl_igo_p, mask_p, apply_mask=True,
                       out_dtype=jnp.float32, **common)

    return x2_p[:N, :H].reshape(B, S, H)


# ---------------------------------------------------------------------------
# Glue: dense normalized adjacency exactly like PyG GCNConv's gcn_norm
# (add self-loops with weight 1, deg from target index, D^-1/2 A D^-1/2).
# ---------------------------------------------------------------------------
def build_gcn_adjacency(edge_index, edge_weight, num_nodes):
    loop = jnp.arange(num_nodes, dtype=edge_index.dtype)
    row = jnp.concatenate([edge_index[0], loop])      # source j
    col = jnp.concatenate([edge_index[1], loop])      # target i
    w = jnp.concatenate([edge_weight, jnp.ones((num_nodes,), jnp.float32)])
    deg = jnp.zeros((num_nodes,), jnp.float32).at[col].add(w)
    dis = jnp.where(deg > 0, jax.lax.rsqrt(deg), 0.0)
    norm = dis[row] * w * dis[col]
    # out[i] = sum_{(j->i)} norm * x[j]  =>  A[i, j] += norm
    A = jnp.zeros((num_nodes, num_nodes), jnp.float32).at[col, row].add(norm)
    return A


# ---------------------------------------------------------------------------
# Pure-JAX reference (same math, high precision) for the correctness check.
# ---------------------------------------------------------------------------
def graph_encoder_ref(x, A, params, mask_flat):
    H = x.shape[1]
    hi = jax.lax.Precision.HIGHEST

    def gcn(xi, w, b):
        return jnp.dot(jnp.dot(A, xi, precision=hi), w, precision=hi) + b

    def lstm2(x0, x1):
        def step(xt, h, c):
            g_all = (jnp.dot(xt, params["wih"], precision=hi)
                     + jnp.dot(h, params["whh"], precision=hi)
                     + params["blstm"])
            i = jax.nn.sigmoid(g_all[:, 0:H])
            f = jax.nn.sigmoid(g_all[:, H:2 * H])
            g = jnp.tanh(g_all[:, 2 * H:3 * H])
            o = jax.nn.sigmoid(g_all[:, 3 * H:4 * H])
            c = f * c + i * g
            return o * jnp.tanh(c), c
        z = jnp.zeros_like(x0)
        h, c = step(x0, z, z)
        h, c = step(x1, h, c)
        return h

    x1 = lstm2(x, gcn(x, params["w1"], params["b1"]))
    x2 = lstm2(x1, gcn(x1, params["w2"], params["b2"]))
    return x2 * mask_flat


if __name__ == "__main__":
    # Small shapes implied by the forward: hidden size H, N = B*S graph nodes.
    B, S, H = 2, 8, 32
    N = B * S

    key = jax.random.PRNGKey(0)
    ks = jax.random.split(key, 10)
    scale = 1.0 / np.sqrt(H)

    # Deterministic synthetic parameters (shapes per nn module __init__).
    params = {
        "w1": jax.random.uniform(ks[0], (H, H), jnp.float32, -scale, scale),
        "b1": jax.random.uniform(ks[1], (1, H), jnp.float32, -scale, scale),
        "w2": jax.random.uniform(ks[2], (H, H), jnp.float32, -scale, scale),
        "b2": jax.random.uniform(ks[3], (1, H), jnp.float32, -scale, scale),
        # torch LSTM stores W_ih/W_hh as [4H, H]; we keep the transpose [H, 4H]
        "wih": jax.random.uniform(ks[4], (H, 4 * H), jnp.float32, -scale, scale),
        "whh": jax.random.uniform(ks[5], (H, 4 * H), jnp.float32, -scale, scale),
        # b_ih + b_hh folded into one bias
        "blstm": jax.random.uniform(ks[6], (1, 4 * H), jnp.float32, -scale, scale),
    }

    # Node features.
    x = jax.random.normal(ks[7], (N, H), jnp.float32)

    # Simple bidirectional chain graph inside each sequence (no cross-batch edges).
    src, dst = [], []
    for b in range(B):
        for s in range(S - 1):
            a, c = b * S + s, b * S + s + 1
            src += [a, c]
            dst += [c, a]
    edge_index = jnp.array([src, dst], dtype=jnp.int32)          # [2, E]
    E = edge_index.shape[1]
    edge_attr = jax.random.uniform(ks[8], (E,), jnp.float32, 0.5, 1.5)

    # Pad mask [B, S, 1]: batch 0 fully valid, batch 1 only first 5 positions.
    mask_np = np.ones((B, S, 1), np.float32)
    mask_np[1, 5:, 0] = 0.0
    mask_pad = jnp.asarray(mask_np)

    # Glue: dense normalized adjacency (built once, outside the hot path).
    A = build_gcn_adjacency(edge_index, edge_attr, N)

    # f32 here so the reference check stays tight; on v6e/v7x at realistic
    # sizes pass compute_dtype=jnp.bfloat16 (A and x1 are then stored bf16 in
    # HBM, accumulation stays f32) and loosen the tolerance accordingly.
    out = graph_encoder_pallas(x, A, params, mask_pad,
                               tile_n=128, compute_dtype=jnp.float32)
    jax.block_until_ready(out)

    ref = graph_encoder_ref(x, A, params, mask_pad.reshape(N, 1)).reshape(B, S, H)
    np.testing.assert_allclose(np.asarray(out), np.asarray(ref),
                               rtol=1e-4, atol=1e-4)
    assert out.shape == (B, S, H) and np.all(np.isfinite(np.asarray(out)))

    print("KERNEL_OK")
</pallas_src>

<mosaic_0001>
module attributes {stable_mosaic.version = 11 : i64} {
  func.func @gcn_lstm_layer_kernel(%arg0: i32, %arg1: memref<16x128xf32, #tpu.memory_space<vmem>>, %arg2: memref<8x16xf32, #tpu.memory_space<vmem>>, %arg3: memref<128x128xf32, #tpu.memory_space<vmem>>, %arg4: memref<1x128xf32, #tpu.memory_space<vmem>>, %arg5: memref<128x384xf32, #tpu.memory_space<vmem>>, %arg6: memref<256x512xf32, #tpu.memory_space<vmem>>, %arg7: memref<1x512xf32, #tpu.memory_space<vmem>>, %arg8: memref<1x384xf32, #tpu.memory_space<vmem>>, %arg9: memref<8x128xf32, #tpu.memory_space<vmem>>) attributes {dimension_semantics = [#tpu.dimension_semantics<parallel>], iteration_bounds = array<i64: 2>, scalar_prefetch = 0 : i64, scratch_operands = 0 : i64, tpu.core_type = #tpu.core_type<tc>, window_params = [{pipeline_mode = #tpu.pipeline_mode<synchronous>, transform_indices = @transform_0, window_bounds = array<i64: 16, 128>}, {transform_indices = @transform_1, window_bounds = array<i64: 8, 16>}, {pipeline_mode = #tpu.pipeline_mode<synchronous>, transform_indices = @transform_2, window_bounds = array<i64: 128, 128>}, {pipeline_mode = #tpu.pipeline_mode<synchronous>, transform_indices = @transform_3, window_bounds = array<i64: 1, 128>}, {pipeline_mode = #tpu.pipeline_mode<synchronous>, transform_indices = @transform_4, window_bounds = array<i64: 128, 384>}, {pipeline_mode = #tpu.pipeline_mode<synchronous>, transform_indices = @transform_5, window_bounds = array<i64: 256, 512>}, {pipeline_mode = #tpu.pipeline_mode<synchronous>, transform_indices = @transform_6, window_bounds = array<i64: 1, 512>}, {pipeline_mode = #tpu.pipeline_mode<synchronous>, transform_indices = @transform_7, window_bounds = array<i64: 1, 384>}, {transform_indices = @transform_8, window_bounds = array<i64: 8, 128>}]} {
    %c8_i32 = arith.constant 8 : i32
    %0 = arith.muli %arg0, %c8_i32 : i32
    %1 = tpu.assume_multiple %0, 8 : i32
    %c0 = arith.constant 0 : index
    %c0_0 = arith.constant 0 : index
    %2 = vector.load %arg1[%c0, %c0_0] : memref<16x128xf32, #tpu.memory_space<vmem>>, vector<16x128xf32>
    %3 = arith.index_cast %1 : i32 to index
    %c0_1 = arith.constant 0 : index
    %4 = vector.load %arg1[%3, %c0_1] : memref<16x128xf32, #tpu.memory_space<vmem>>, vector<8x128xf32>
    %c0_2 = arith.constant 0 : index
    %c0_3 = arith.constant 0 : index
    %5 = vector.load %arg2[%c0_2, %c0_3] : memref<8x16xf32, #tpu.memory_space<vmem>>, vector<8x16xf32>
    %cst = arith.constant dense<0.000000e+00> : vector<8x128xf32>
    %6 = tpu.matmul %5, %2, %cst {dimension_numbers = #tpu.dot_dimension_numbers<[1], [0], [0], [1], [0, 0, 1, 1], [], []>} : vector<8x16xf32>, vector<16x128xf32>, vector<8x128xf32> -> vector<8x128xf32>
    %c0_4 = arith.constant 0 : index
    %c0_5 = arith.constant 0 : index
    %7 = vector.load %arg3[%c0_4, %c0_5] : memref<128x128xf32, #tpu.memory_space<vmem>>, vector<128x128xf32>
    %cst_6 = arith.constant dense<0.000000e+00> : vector<8x128xf32>
    %8 = tpu.matmul %6, %7, %cst_6 {dimension_numbers = #tpu.dot_dimension_numbers<[1], [0], [0], [1], [0, 0, 1, 1], [], []>} : vector<8x128xf32>, vector<128x128xf32>, vector<8x128xf32> -> vector<8x128xf32>
    %c0_7 = arith.constant 0 : index
    %c0_8 = arith.constant 0 : index
    %9 = vector.load %arg4[%c0_7, %c0_8] : memref<1x128xf32, #tpu.memory_space<vmem>>, vector<1x128xf32>
    %10 = vector.broadcast %9 : vector<1x128xf32> to vector<8x128xf32>
    %11 = arith.addf %8, %10 : vector<8x128xf32>
    %c0_9 = arith.constant 0 : index
    %c0_10 = arith.constant 0 : index
    %12 = vector.load %arg5[%c0_9, %c0_10] : memref<128x384xf32, #tpu.memory_space<vmem>>, vector<128x384xf32>
    %cst_11 = arith.constant dense<0.000000e+00> : vector<8x384xf32>
    %13 = tpu.matmul %4, %12, %cst_11 {dimension_numbers = #tpu.dot_dimension_numbers<[1], [0], [0], [1], [0, 0, 1, 1], [], []>} : vector<8x128xf32>, vector<128x384xf32>, vector<8x384xf32> -> vector<8x384xf32>
    %c0_12 = arith.constant 0 : index
    %c0_13 = arith.constant 0 : index
    %14 = vector.load %arg8[%c0_12, %c0_13] : memref<1x384xf32, #tpu.memory_space<vmem>>, vector<1x384xf32>
    %15 = vector.broadcast %14 : vector<1x384xf32> to vector<8x384xf32>
    %16 = arith.addf %13, %15 : vector<8x384xf32>
    %17 = vector.extract_strided_slice %16 {offsets = [0, 0], sizes = [8, 128], strides = [1, 1]} : vector<8x384xf32> to vector<8x128xf32>
    %18 = arith.negf %17 : vector<8x128xf32>
    %19 = math.exp %18 : vector<8x128xf32>
    %cst_14 = arith.constant 1.000000e+00 : f32
    %20 = vector.broadcast %cst_14 : f32 to vector<8x128xf32>
    %21 = arith.addf %20, %19 : vector<8x128xf32>
    %22 = arith.divf %20, %21 : vector<8x128xf32>
    %23 = vector.extract_strided_slice %16 {offsets = [0, 128], sizes = [8, 128], strides = [1, 1]} : vector<8x384xf32> to vector<8x128xf32>
    %24 = math.tanh %23 : vector<8x128xf32>
    %25 = vector.extract_strided_slice %16 {offsets = [0, 256], sizes = [8, 128], strides = [1, 1]} : vector<8x384xf32> to vector<8x128xf32>
    %26 = arith.negf %25 : vector<8x128xf32>
    %27 = math.exp %26 : vector<8x128xf32>
    %cst_15 = arith.constant 1.000000e+00 : f32
    %28 = vector.broadcast %cst_15 : f32 to vector<8x128xf32>
    %29 = arith.addf %28, %27 : vector<8x128xf32>
    %30 = arith.divf %28, %29 : vector<8x128xf32>
    %31 = arith.mulf %22, %24 : vector<8x128xf32>
    %32 = math.tanh %31 : vector<8x128xf32>
    %33 = arith.mulf %30, %32 : vector<8x128xf32>
    %34 = tpu.concatenate %11, %33 in 1 : vector<8x128xf32>, vector<8x128xf32> -> vector<8x256xf32>
    %c0_16 = arith.constant 0 : index
    %c0_17 = arith.constant 0 : index
    %35 = vector.load %arg6[%c0_16, %c0_17] : memref<256x512xf32, #tpu.memory_space<vmem>>, vector<256x512xf32>
    %cst_18 = arith.constant dense<0.000000e+00> : vector<8x512xf32>
    %36 = tpu.matmul %34, %35, %cst_18 {dimension_numbers = #tpu.dot_dimension_numbers<[1], [0], [0], [1], [0, 0, 1, 1], [], []>} : vector<8x256xf32>, vector<256x512xf32>, vector<8x512xf32> -> vector<8x512xf32>
    %c0_19 = arith.constant 0 : index
    %c0_20 = arith.constant 0 : index
    %37 = vector.load %arg7[%c0_19, %c0_20] : memref<1x512xf32, #tpu.memory_space<vmem>>, vector<1x512xf32>
    %38 = vector.broadcast %37 : vector<1x512xf32> to vector<8x512xf32>
    %39 = arith.addf %36, %38 : vector<8x512xf32>
    %40 = vector.extract_strided_slice %39 {offsets = [0, 0], sizes = [8, 128], strides = [1, 1]} : vector<8x512xf32> to vector<8x128xf32>
    %41 = arith.negf %40 : vector<8x128xf32>
    %42 = math.exp %41 : vector<8x128xf32>
    %cst_21 = arith.constant 1.000000e+00 : f32
    %43 = vector.broadcast %cst_21 : f32 to vector<8x128xf32>
    %44 = arith.addf %43, %42 : vector<8x128xf32>
    %45 = arith.divf %43, %44 : vector<8x128xf32>
    %46 = vector.extract_strided_slice %39 {offsets = [0, 128], sizes = [8, 128], strides = [1, 1]} : vector<8x512xf32> to vector<8x128xf32>
    %47 = arith.negf %46 : vector<8x128xf32>
    %48 = math.exp %47 : vector<8x128xf32>
    %cst_22 = arith.constant 1.000000e+00 : f32
    %49 = vector.broadcast %cst_22 : f32 to vector<8x128xf32>
    %50 = arith.addf %49, %48 : vector<8x128xf32>
    %51 = arith.divf %49, %50 : vector<8x128xf32>
    %52 = vector.extract_strided_slice %39 {offsets = [0, 256], sizes = [8, 128], strides = [1, 1]} : vector<8x512xf32> to vector<8x128xf32>
    %53 = math.tanh %52 : vector<8x128xf32>
    %54 = vector.extract_strided_slice %39 {offsets = [0, 384], sizes = [8, 128], strides = [1, 1]} : vector<8x512xf32> to vector<8x128xf32>
    %55 = arith.negf %54 : vector<8x128xf32>
    %56 = math.exp %55 : vector<8x128xf32>
    %cst_23 = arith.constant 1.000000e+00 : f32
    %57 = vector.broadcast %cst_23 : f32 to vector<8x128xf32>
    %58 = arith.addf %57, %56 : vector<8x128xf32>
    %59 = arith.divf %57, %58 : vector<8x128xf32>
    %60 = arith.mulf %51, %31 : vector<8x128xf32>
    %61 = arith.mulf %45, %53 : vector<8x128xf32>
    %62 = arith.addf %60, %61 : vector<8x128xf32>
    %63 = math.tanh %62 : vector<8x128xf32>
    %64 = arith.mulf %59, %63 : vector<8x128xf32>
    %c0_24 = arith.constant 0 : index
    %c0_25 = arith.constant 0 : index
    %65 = vector.load %arg9[%c0_24, %c0_25] : memref<8x128xf32, #tpu.memory_space<vmem>>, vector<8x128xf32>
    tpu.vector_store %arg9[%c0_24, %c0_25], %64 {strides = array<i32>} : memref<8x128xf32, #tpu.memory_space<vmem>>, vector<8x128xf32>,
    return
  }
  func.func @transform_0(%arg0: i32) -> (i32, i32) {
    %c0_i32 = arith.constant 0 : i32
    %c0_i32_0 = arith.constant 0 : i32
    %c0_i32_1 = arith.constant 0 : i32
    return %c0_i32, %c0_i32_0 : i32, i32
  }
  func.func @transform_1(%arg0: i32) -> (i32, i32) {
    %c0_i32 = arith.constant 0 : i32
    %c0_i32_0 = arith.constant 0 : i32
    return %arg0, %c0_i32 : i32, i32
  }
  func.func @transform_2(%arg0: i32) -> (i32, i32) {
    %c0_i32 = arith.constant 0 : i32
    %c0_i32_0 = arith.constant 0 : i32
    %c0_i32_1 = arith.constant 0 : i32
    return %c0_i32, %c0_i32_0 : i32, i32
  }
  func.func @transform_3(%arg0: i32) -> (i32, i32) {
    %c0_i32 = arith.constant 0 : i32
    %c0_i32_0 = arith.constant 0 : i32
    %c0_i32_1 = arith.constant 0 : i32
    return %c0_i32, %c0_i32_0 : i32, i32
  }
  func.func @transform_4(%arg0: i32) -> (i32, i32) {
    %c0_i32 = arith.constant 0 : i32
    %c0_i32_0 = arith.constant 0 : i32
    %c0_i32_1 = arith.constant 0 : i32
    return %c0_i32, %c0_i32_0 : i32, i32
  }
  func.func @transform_5(%arg0: i32) -> (i32, i32) {
    %c0_i32 = arith.constant 0 : i32
    %c0_i32_0 = arith.constant 0 : i32
    %c0_i32_1 = arith.constant 0 : i32
    return %c0_i32, %c0_i32_0 : i32, i32
  }
  func.func @transform_6(%arg0: i32) -> (i32, i32) {
    %c0_i32 = arith.constant 0 : i32
    %c0_i32_0 = arith.constant 0 : i32
    %c0_i32_1 = arith.constant 0 : i32
    return %c0_i32, %c0_i32_0 : i32, i32
  }
  func.func @transform_7(%arg0: i32) -> (i32, i32) {
    %c0_i32 = arith.constant 0 : i32
    %c0_i32_0 = arith.constant 0 : i32
    %c0_i32_1 = arith.constant 0 : i32
    return %c0_i32, %c0_i32_0 : i32, i32
  }
  func.func @transform_8(%arg0: i32) -> (i32, i32) {
    %c0_i32 = arith.constant 0 : i32
    %c0_i32_0 = arith.constant 0 : i32
    return %arg0, %c0_i32 : i32, i32
  }
}

</mosaic_0001>

<bundles_post_ra>
// kernel: tpu_custom_call.1
= control target key start
LH: loop header
LB: loop body
LE: loop exit
PB: predicated region body
PF: predicated region fallthrough
CT: control target
= control target key end

     0   :  { %s1863_s0 = inlined_call_operand.hbm [shape: f32[16,128], index: 0, kind: input, shape index: {}]   ;;  %s1864_s1 = inlined_call_operand.hbm [shape: f32[16,16], index: 1, kind: input, shape index: {}]   ;;  %s1865_s2 = inlined_call_operand.hbm [shape: f32[128,128], index: 2, kind: input, shape index: {}]   ;;  %s1866_s3 = inlined_call_operand.vmem [shape: f32[1,128], index: 3, kind: input, shape index: {}]   ;;  %s1867_s4 = inlined_call_operand.hbm [shape: f32[128,384], index: 4, kind: input, shape index: {}]   ;;  %s1868_s5 = inlined_call_operand.hbm [shape: f32[256,512], index: 5, kind: input, shape index: {}]   ;;  %s1869_s6 = inlined_call_operand.vmem [shape: f32[1,512], index: 6, kind: input, shape index: {}]   ;;  %s1870_s7 = inlined_call_operand.hbm [shape: f32[1,384], index: 7, kind: input, shape index: {}]   ;;  %s1871_s8 = inlined_call_operand.hbm [shape: f32[16,128], index: 8, kind: output, shape index: {}]  }
   0x1   :  { %1872 = sst [smem:[#allocation20_spill]] %s1863_s0 }
   0x2   :  { %1873 = sst [smem:[#allocation21_spill]] %s1865_s2 }
   0x3   :  { %1874 = sst [smem:[#allocation22_spill]] %s1867_s4 }
   0x4   :  { %1875 = sst [smem:[#allocation23_spill]] %s1868_s5 }
   0x5   :  { %13 = vsyncpa [#allocation3], 0 }
   0x6   :  { %14 = vsyncpa [#allocation6], 0 }
   0x7   :  { %16 = vsyncpa [#allocation6 + $0x1], 0 }
   0x8   :  { %17 = vsyncpa [#allocation9], 0 }
   0x9   :  { %18 = vsyncpa [#allocation12], 0 }
   0xa   :  { %19 = vsyncpa [#allocation4], 0 }
   0xb   :  { %21 = vsyncpa [#allocation4 + $0x1], 0  ;;  %s1613_s27 = smov 0   ;;  %s1615_s28 = smov 0  }
   0xc   :  { %s1617_s29 = smov 0   ;;  %s1619_s30 = smov 0  }
   0xd LB: > { %s1634_s9 = sadd.s32 4294967295, %s1555_s30   ;;  %p1133_p0 = scmp.ge.s32.totalorder %s1555_s30, 1  ;;  %s1555_s30 = sphi %s1619_s30, %s1897_s30   ;;  %s1551_s29 = sphi %s1617_s29, %s1896_s29   ;;  %s1547_s28 = sphi %s1615_s28, %s1895_s28   ;;  %s1543_s27 = sphi %s1613_s27, %s1894_s27  }
   0xe   : > { %p69_p1 = scmp.eq.s32.totalorder %s1634_s9, 0  ;;  %p231_p2 = scmp.lt.s32.totalorder %s1555_s30, 3 }
   0xf   : > { %s1876_s2 = sld [smem:[#allocation21_spill]]  ;;  %s1557_s14 = smov [#allocation7]  }
  0x10   : > { %p1642_p3 = pnand %p1133_p0, %p231_p2  ;;  %s258_s15 = sshll.u32 %s1557_s14, 4  ;;  %s259_s15 = int_to_ptr.vmem [resolvable:$true] %s258_s15 }
  0x11   : > { %s1878_s4 = sld [smem:[#allocation22_spill]]  ;;  %s1558_s20 = smov [#allocation8]  }
  0x12   : > { %p1185_p5 = pneg %p1642_p3  ;;  %s275_s21 = sshll.u32 %s1558_s20, 4  ;;  %s276_s21 = int_to_ptr.vmem [resolvable:$true] %s275_s21 }
  0x13   : > { %s1559_s22 = smov 128   ;;  %s1560_s23 = smov 8  }
  0x14   : > { %p1654_p6 = pnand %p1185_p5, %p69_p1  ;;  %s1561_s24 = smov 384  }
  0x15   : > { %s256_s12 = sshll.u32 %s1876_s2, 4  ;;  %s1562_s25 = smov 24   ;;  %s257_s12 = int_to_ptr.hbm [resolvable:$true] %s256_s12 }
  0x16   : > { %1191 = dma.hbm_to_vmem [thread:$0]  (!%p1654_p6), %s257_s12, 2048, %s259_s15, [#allocation6], %s1559_s22, %s1559_s22, %s1560_s23  }
  0x17   : > { %s273_s18 = sshll.u32 %s1878_s4, 4  ;;  %s1880_s0 = sld [smem:[#allocation20_spill]]  ;;  %s274_s18 = int_to_ptr.hbm [resolvable:$true] %s273_s18 }
  0x18   : > { %1194 = dma.hbm_to_vmem [thread:$0]  (!%p1654_p6), %s274_s18, 6144, %s276_s21, [#allocation9], %s1561_s24, %s1561_s24, %s1562_s25  }
  0x19   : > { %s1563_s14 = smov [#allocation2]   ;;  %s1881_s5 = sld [smem:[#allocation23_spill]] }
  0x1a   : > { %s244_s16 = sshll.u32 %s1563_s14, 4  ;;  %s1564_s15 = smov [#allocation10]   ;;  %s245_s16 = int_to_ptr.vmem [resolvable:$true] %s244_s16 }
  0x1b   : > { %s289_s18 = sshll.u32 %s1564_s15, 4  ;;  %s1565_s21 = smov 512   ;;  %s290_s18 = int_to_ptr.vmem [resolvable:$true] %s289_s18 }
  0x1c   : > { %s1566_s24 = smov 32   ;;  %s1679_s14 = sadd.s32 1, %s1555_s30  }
  0x1d   : > { %s242_s11 = sshll.u32 %s1880_s0, 4  ;;  %s52_s17 = ssub.s32 %s1555_s30, %s1679_s14  ;;  %s243_s11 = int_to_ptr.hbm [resolvable:$true] %s242_s11 }
  0x1e   : > { %1188 = dma.hbm_to_vmem [thread:$0]  (!%p1654_p6), %s243_s11, 256, %s245_s16, [#allocation3], %s1559_s22, %s1559_s22, %s1560_s23  }
  0x1f   : > { %s287_s12 = sshll.u32 %s1881_s5, 4  ;;  %s305_s22 = sshll.u32 %s1870_s7, 4  ;;  %s288_s12 = int_to_ptr.hbm [resolvable:$true] %s287_s12  ;;  %s306_s22 = int_to_ptr.hbm [resolvable:$true] %s305_s22 }
  0x20   : > { %1197 = dma.hbm_to_vmem [thread:$0]  (!%p1654_p6), %s288_s12, 16384, %s290_s18, [#allocation9], %s1565_s21, %s1565_s21, %s1566_s24  }
  0x21   : > { %s1567_s23 = smov [#allocation11]   ;;  %s1132_s11 = sadd.s32 4294967294, %s1555_s30  }
  0x22   : > { %s307_s10 = sshll.u32 %s1567_s23, 4  ;;  %s55_s16 = sadd.s32 1, %s1551_s29  ;;  %s308_s10 = int_to_ptr.vmem [resolvable:$true] %s307_s10 }
  0x23   : > { %1200 = dma.hbm_to_vmem [thread:$0]  (!%p1654_p6), %s306_s22, 48, %s308_s10, [#allocation12]  }
  0x24   : > { %p62_p7 = scmp.ne.s32.totalorder %s1551_s29, %s1547_s28  ;;  %p53_p8 = scmp.eq.s32.totalorder %s52_s17, 0 }
  0x25   : > { %p63_p9 = scmp.eq.s32.totalorder %s1555_s30, 0  ;;  %p68_p10 = scmp.ne.s32.totalorder %s1547_s28, %s1543_s27 }
  0x26   : > { %p218_p11 = scmp.eq.s32.totalorder %s1634_s9, 1  ;;  %p224_p2 = scmp.eq.s32.totalorder %s1132_s11, 1 }
  0x27   : > { %s1691_s20 = scalar_select %p53_p8, %s1551_s29, %s55_s16  }
  0x28   : > { %p1693_p12 = por %p63_p9, %p62_p7  ;;  %p1699_p13 = por %p69_p1, %p68_p10 }
  0x29   : > { %p1703_p0 = por %p218_p11, %p62_p7  ;;  %p1214_p5 = scmp.lt.s32.totalorder %s1555_s30, 2 }
  0x2a   : > { %s318_s18 = sand.u32 1, %s1555_s30   ;;  %p1709_p6 = por %p224_p2, %p68_p10 }
  0x2b   : > { %s320_s24 = sand.u32 1, %s1551_s29   ;;  %s1141_s25 = sshll.u32 %s1555_s30, 3 }
  0x2c   : > { %s1140_s26 = sshll.u32 %s320_s24, 3  ;;  %s326_s10 = scalar_lea.hbm %s1864_s1, %s1141_s25 }
  0x2d   : > { %s328_s16 = sshll.u32 %s326_s10, 4  ;;  %s322_s17 = scalar_lea.vmem [#allocation5], %s1140_s26  ;;  %s329_s16 = int_to_ptr.hbm [resolvable:$true] %s328_s16 }
  0x2e   : > { %s330_s0 = sshll.u32 %s322_s17, 4  ;;  %p1720_p7 = pnand %p1214_p5, %p1693_p12  ;;  %s331_s0 = int_to_ptr.vmem [resolvable:$true] %s330_s0 }
  0x2f   : > { %s319_s2 = scalar_lea.sflag [#allocation6], %s318_s18  ;;  %s1443_s4 = sshra.s32 %s329_s16, 4  ;;  %s1444_s4 = int_to_ptr.hbm [resolvable:$true] %s1443_s4 }
  0x30   : > { %s1445_s5 = scalar_lea.hbm %s1444_s4, 8  ;;  %p1447_p9 = pneg %p1720_p7 }
  0x31   : > { %p1446_p8 = scmp.ne.s32.totalorder %s1444_s4, %s1445_s5  ;;  %s1450_s26 = scalar_lea.hbm %s1864_s1, 16 }
  0x32   : > { %p1451_p12 = scmp.lt.s32.totalorder %s1444_s4, %s1864_s1  ;;  %p1452_p2 = scmp.lt.s32.totalorder %s1450_s26, %s1445_s5 }
  0x33   : > { %p1448_p10 = pnand %p1447_p9, %p1446_p8 }
  0x34   : > { %p1453_p5 = por %p1452_p2, %p1451_p12 }
  0x35   : > { %p1449_p11 = pneg %p1448_p10 }
  0x37   : > { %p1454_p4 = pnand %p1453_p5, %p1449_p11 }
  0x39   : > { %1457 = shalt.err (!%p1454_p4)
}
  0x3a   : > { %1204 = dma.hbm_to_vmem [thread:$0]  (!%p1720_p7), %s329_s16, 128, %s331_s0, %s319_s2  }
  0x3b   : > { %339 = sbr.rel (%p1642_p3) target bundleno = 513 (0x201), region = 52 }
  0x40   : > { %1518 = dma.done.wait (%p69_p1), [#allocation3], 256  }
  0x41   : > { %1520 = vsyncadd (%p69_p1), [#allocation3], 4294967040  ;;  %s346_s4 = sand.u32 1, %s1634_s9   ;;  %s348_s5 = sand.u32 1, %s1547_s28  }
  0x42   : > { %s1744_s18 = sshll.u32 %s348_s5, 3  ;;  %s347_s0 = scalar_lea.sflag [#allocation6], %s346_s4 }
  0x43   : > { %s350_s2 = scalar_lea.vmem [#allocation5], %s1744_s18 }
  0x44   : > { %1522 = dma.done.wait (%p1699_p13), %s347_s0, 128  }
  0x45   : > { %1524 = vsyncadd (%p1699_p13), %s347_s0, 4294967168 }
  0x46   : > { %1526 = dma.done.wait (%p69_p1), [#allocation6], 2048  }
  0x47   : > { %1528 = vsyncadd (%p69_p1), [#allocation6], 4294965248 }
  0x48   : > { %1530 = dma.done.wait (%p69_p1), [#allocation9], 22528  }
  0x49   : > { %1532 = vsyncadd (%p69_p1), [#allocation9], 4294944768 }
  0x4a   : > { %1534 = dma.done.wait (%p69_p1), [#allocation12], 48  }
  0x4b   : > { %1536 = vsyncadd (%p69_p1), [#allocation12], 4294967248  ;;  %v406_v0 = vld [vmem:[#allocation2 + $0x8] sm:$0xff]  ;;  %v405_v1 = vld [vmem:[#allocation2] sm:$0xff]  ;;  %vm410_vm0 = vcmask 130048   ;;  %s1150_s13 = sshll.u32 %s1634_s9, 3 }
  0x4c   : > { %428 = vmatpush.msra.mxu0 %v406_v0  ;;  %v409_v2 = vld [vmem:[%s350_s2] sm:$0xff]  ;;  %v519_v3 = vld [vmem:[#allocation8 + $0x168] sm:$0xff]  ;;  %v518_v7 = vld [vmem:[#allocation8 + $0x160] sm:$0xff]  ;;  %s407_s12 = scalar_lea.vmem [#allocation2], %s1150_s13  ;;  %s1005_s25 = scalar_lea.hbm %s1871_s8, %s1150_s13 }
  0x4d   : > { %v516_v4 = vld [vmem:[#allocation8 + $0x150] sm:$0xff]  ;;  %530 = vmatpush.msra.mxu2 %v519_v3  ;;  %v513_v5 = vld [vmem:[#allocation8 + $0x138] sm:$0xff]  ;;  %v510_v8 = vld [vmem:[#allocation8 + $0x120] sm:$0xff]  ;;  %s1009_s26 = sshll.u32 %s1005_s25, 4  ;;  %s403_s22 = scalar_lea.vmem [#allocation13], %s1744_s18  ;;  %s1010_s26 = int_to_ptr.hbm [resolvable:$true] %s1009_s26 }
  0x4e   : > { %429 = vmatpush.msra.mxu0 %v405_v1  ;;  %v521_v6 = vld [vmem:[#allocation8 + $0x178] sm:$0xff]  ;;  %v520_v9 = vld [vmem:[#allocation8 + $0x170] sm:$0xff]  ;;  %v515_v10 = vld [vmem:[#allocation8 + $0x148] sm:$0xff]  ;;  %s1007_s19 = sshll.u32 %s403_s22, 4  ;;  %s995_s9 = scalar_lea.sflag [#allocation4], %s348_s5  ;;  %s1008_s19 = int_to_ptr.vmem [resolvable:$true] %s1007_s19 }
  0x4f   : > { %1151 = vmatmul.msk.f32.vlgmr.msra.gmra.mxu0 %vm410_vm0, %v409_v2  ;;  %531 = vmatpush.msra.mxu2 %v516_v4  ;;  %v517_v11 = vld [vmem:[#allocation8 + $0x158] sm:$0xff]  ;;  %v507_v12 = vld [vmem:[#allocation8 + $0x108] sm:$0xff]  ;;  %v514_v13 = vld [vmem:[#allocation8 + $0x140] sm:$0xff]  ;;  %s1487_s4 = sshra.s32 %s1010_s26, 4  ;;  %s1493_s18 = scalar_lea.hbm %s1871_s8, 16  ;;  %s1488_s4 = int_to_ptr.hbm [resolvable:$true] %s1487_s4 }
  0x50   : > { %570 = vmatpush.msrb.mxu0 %v521_v6  ;;  %550 = vmatpush.msra.mxu3 %v520_v9  ;;  %v512_v14 = vld [vmem:[#allocation8 + $0x130] sm:$0xff]  ;;  %v511_v16 = vld [vmem:[#allocation8 + $0x128] sm:$0xff]  ;;  %v509_v17 = vld [vmem:[#allocation8 + $0x118] sm:$0xff]  ;;  %s1489_s0 = scalar_lea.hbm %s1488_s4, 8  ;;  %p1494_p13 = scmp.lt.s32.totalorder %s1488_s4, %s1871_s8 }
  0x51   : > { %532 = vmatpush.msra.mxu2 %v513_v5  ;;  %v504_v15 = vld [vmem:[#allocation8 + $0xf0] sm:$0xff]  ;;  %v501_v18 = vld [vmem:[#allocation8 + $0xd8] sm:$0xff]  ;;  %v506_v20 = vld [vmem:[#allocation8 + $0x100] sm:$0xff]  ;;  %p1490_p1 = scmp.ne.s32.totalorder %s1488_s4, %s1489_s0  ;;  %p1495_p7 = scmp.lt.s32.totalorder %s1493_s18, %s1489_s0 }
  0x52   : > { %571 = vmatpush.msrb.mxu0 %v518_v7  ;;  %551 = vmatpush.msra.mxu3 %v517_v11  ;;  %v508_v19 = vld [vmem:[#allocation8 + $0x110] sm:$0xff]  ;;  %v498_v21 = vld [vmem:[#allocation8 + $0xc0] sm:$0xff]  ;;  %v505_v22 = vld [vmem:[#allocation8 + $0xf8] sm:$0xff] }
  0x53   : > { %533 = vmatpush.msra.mxu2 %v510_v8  ;;  %v503_v23 = vld [vmem:[#allocation8 + $0xe8] sm:$0xff]  ;;  %v502_v25 = vld [vmem:[#allocation8 + $0xe0] sm:$0xff]  ;;  %v500_v26 = vld [vmem:[#allocation8 + $0xd0] sm:$0xff]  ;;  %p1491_p3 = pnand %p1490_p1, %p1703_p0  ;;  %p1496_p8 = por %p1495_p7, %p1494_p13 }
  0x54   : > { %572 = vmatpush.msrb.mxu0 %v515_v10  ;;  %552 = vmatpush.msra.mxu3 %v514_v13  ;;  %v495_v24 = vld [vmem:[#allocation8 + $0xa8] sm:$0xff]  ;;  %v492_v27 = vld [vmem:[#allocation8 + $0x90] sm:$0xff]  ;;  %v449_v29 = vld [vmem:[#allocation7 + $0x78] sm:$0xff] }
  0x55   : > { %534 = vmatpush.msra.mxu2 %v507_v12  ;;  %v499_v28 = vld [vmem:[#allocation8 + $0xc8] sm:$0xff]  ;;  %v497_v30 = vld [vmem:[#allocation8 + $0xb8] sm:$0xff]  ;;  %v448_v31 = vld [vmem:[#allocation7 + $0x70] sm:$0xff]  ;;  %454 = vmatpush.msra.mxu1 %v449_v29  ;;  %p1492_p4 = pneg %p1491_p3 }
  0x56   : > { %573 = vmatpush.msrb.mxu0 %v512_v14  ;;  %553 = vmatpush.msra.mxu3 %v511_v16  ;;  %v489_v32 = vld [vmem:[#allocation8 + $0x78] sm:$0xff]  ;;  %v496_v33 = vld [vmem:[#allocation8 + $0xb0] sm:$0xff]  ;;  %v494_v34 = vld [vmem:[#allocation8 + $0xa0] sm:$0xff] }
  0x57   : > { %535 = vmatpush.msra.mxu2 %v504_v15  ;;  %v447_v35 = vld [vmem:[#allocation7 + $0x68] sm:$0xff]  ;;  %v486_v36 = vld [vmem:[#allocation8 + $0x60] sm:$0xff]  ;;  %v493_v37 = vld [vmem:[#allocation8 + $0x98] sm:$0xff]  ;;  %455 = vmatpush.msra.mxu1 %v448_v31  ;;  %p1497_p9 = pnand %p1496_p8, %p1492_p4 }
  0x58   : > { %574 = vmatpush.msrb.mxu0 %v509_v17  ;;  %554 = vmatpush.msra.mxu3 %v508_v19  ;;  %v491_v38 = vld [vmem:[#allocation8 + $0x88] sm:$0xff]  ;;  %v446_v39 = vld [vmem:[#allocation7 + $0x60] sm:$0xff]  ;;  %v488_v42 = vld [vmem:[#allocation8 + $0x70] sm:$0xff] }
  0x59   : > { %536 = vmatpush.msra.mxu2 %v501_v18  ;;  %v483_v40 = vld [vmem:[#allocation8 + $0x48] sm:$0xff]  ;;  %v490_v41 = vld [vmem:[#allocation8 + $0x80] sm:$0xff]  ;;  %456 = vmatpush.msra.mxu1 %v447_v35  ;;  %v445_v43 = vld [vmem:[#allocation7 + $0x58] sm:$0xff] }
  0x5a   : > { %575 = vmatpush.msrb.mxu0 %v506_v20  ;;  %555 = vmatpush.msra.mxu3 %v505_v22  ;;  %v480_v44 = vld [vmem:[#allocation8 + $0x30] sm:$0xff]  ;;  %v487_v45 = vld [vmem:[#allocation8 + $0x68] sm:$0xff]  ;;  %v485_v46 = vld [vmem:[#allocation8 + $0x58] sm:$0xff] }
  0x5b   : > { %537 = vmatpush.msra.mxu2 %v498_v21  ;;  %457 = vmatpush.msra.mxu1 %v446_v39  ;;  %v444_v47 = vld [vmem:[#allocation7 + $0x50] sm:$0xff]  ;;  %v477_v48 = vld [vmem:[#allocation8 + $0x18] sm:$0xff]  ;;  %v482_v50 = vld [vmem:[#allocation8 + $0x40] sm:$0xff] }
  0x5c   : > { %576 = vmatpush.msrb.mxu0 %v503_v23  ;;  %556 = vmatpush.msra.mxu3 %v502_v25  ;;  %v484_v49 = vld [vmem:[#allocation8 + $0x50] sm:$0xff]  ;;  %v443_v51 = vld [vmem:[#allocation7 + $0x48] sm:$0xff]  ;;  %v474_v52 = vld [vmem:[#allocation8] sm:$0xff] }
  0x5d   : > { %538 = vmatpush.msra.mxu2 %v495_v24  ;;  %458 = vmatpush.msra.mxu1 %v445_v43  ;;  %v481_v53 = vld [vmem:[#allocation8 + $0x38] sm:$0xff]  ;;  %v408_v54 = vld [vmem:[%s407_s12] sm:$0xff]  ;;  %v479_v55 = vld [vmem:[#allocation8 + $0x28] sm:$0xff] }
  0x5e   : > { %577 = vmatpush.msrb.mxu0 %v500_v26  ;;  %557 = vmatpush.msra.mxu3 %v499_v28  ;;  %v478_v56 = vld [vmem:[#allocation8 + $0x20] sm:$0xff]  ;;  %v476_v58 = vld [vmem:[#allocation8 + $0x10] sm:$0xff]  ;;  %v475_v59 = vld [vmem:[#allocation8 + $0x8] sm:$0xff] }
  0x5f   : > { %539 = vmatpush.msra.mxu2 %v492_v27  ;;  %459 = vmatpush.msra.mxu1 %v444_v47  ;;  %v442_v57 = vld [vmem:[#allocation7 + $0x40] sm:$0xff]  ;;  %v441_v60 = vld [vmem:[#allocation7 + $0x38] sm:$0xff]  ;;  %v440_v61 = vld [vmem:[#allocation7 + $0x30] sm:$0xff] }
  0x60   : > { %578 = vmatpush.msrb.mxu0 %v497_v30  ;;  %558 = vmatpush.msra.mxu3 %v496_v33  ;;  %v439_v62 = vld [vmem:[#allocation7 + $0x28] sm:$0xff]  ;;  %v438_v63 = vld [vmem:[#allocation7 + $0x20] sm:$0xff]  ;;  %v437_v0 = vld [vmem:[#allocation7 + $0x18] sm:$0xff] }
  0x61   : > { %540 = vmatpush.msra.mxu2 %v489_v32  ;;  %460 = vmatpush.msra.mxu1 %v443_v51  ;;  %v436_v1 = vld [vmem:[#allocation7 + $0x10] sm:$0xff]  ;;  %v435_v2 = vld [vmem:[#allocation7 + $0x8] sm:$0xff]  ;;  %v434_v3 = vld [vmem:[#allocation7] sm:$0xff] }
  0x62   : > { %579 = vmatpush.msrb.mxu0 %v494_v34  ;;  %559 = vmatpush.msra.mxu3 %v493_v37  ;;  %v756_v4 = vld [vmem:[#allocation10 + $0x3e0] sm:$0xff]  ;;  %v757_v5 = vld [vmem:[#allocation10 + $0x3e8] sm:$0xff] }
  0x63   : > { %541 = vmatpush.msra.mxu2 %v486_v36  ;;  %461 = vmatpush.msra.mxu1 %v442_v57  ;;  %v752_v6 = vld [vmem:[#allocation10 + $0x3c0] sm:$0xff]  ;;  %v753_v7 = vld [vmem:[#allocation10 + $0x3c8] sm:$0xff] }
  0x64   : > { %580 = vmatpush.msrb.mxu0 %v491_v38  ;;  %560 = vmatpush.msra.mxu3 %v490_v41  ;;  %v748_v8 = vld [vmem:[#allocation10 + $0x3a0] sm:$0xff]  ;;  %v749_v9 = vld [vmem:[#allocation10 + $0x3a8] sm:$0xff] }
  0x65   : > { %542 = vmatpush.msra.mxu2 %v483_v40  ;;  %462 = vmatpush.msra.mxu1 %v441_v60  ;;  %v744_v10 = vld [vmem:[#allocation10 + $0x380] sm:$0xff]  ;;  %v745_v11 = vld [vmem:[#allocation10 + $0x388] sm:$0xff] }
  0x66   : > { %581 = vmatpush.msrb.mxu0 %v488_v42  ;;  %561 = vmatpush.msra.mxu3 %v487_v45  ;;  %v740_v12 = vld [vmem:[#allocation10 + $0x360] sm:$0xff]  ;;  %v741_v13 = vld [vmem:[#allocation10 + $0x368] sm:$0xff] }
  0x67   : > { %543 = vmatpush.msra.mxu2 %v480_v44  ;;  %463 = vmatpush.msra.mxu1 %v440_v61  ;;  %v736_v14 = vld [vmem:[#allocation10 + $0x340] sm:$0xff]  ;;  %v737_v15 = vld [vmem:[#allocation10 + $0x348] sm:$0xff] }
  0x68   : > { %582 = vmatpush.msrb.mxu0 %v485_v46  ;;  %562 = vmatpush.msra.mxu3 %v484_v49  ;;  %v732_v17 = vld [vmem:[#allocation10 + $0x320] sm:$0xff]  ;;  %v733_v18 = vld [vmem:[#allocation10 + $0x328] sm:$0xff] }
  0x69   : > { %544 = vmatpush.msra.mxu2 %v477_v48  ;;  %464 = vmatpush.msra.mxu1 %v439_v62  ;;  %v728_v19 = vld [vmem:[#allocation10 + $0x300] sm:$0xff]  ;;  %v729_v21 = vld [vmem:[#allocation10 + $0x308] sm:$0xff] }
  0x6a   : > { %583 = vmatpush.msrb.mxu0 %v482_v50  ;;  %563 = vmatpush.msra.mxu3 %v481_v53  ;;  %v1766_v20 = vld [vmem:[#allocation11] sm:$0x7]  ;;  %v725_v23 = vld [vmem:[#allocation10 + $0x2e8] sm:$0xff] }
  0x6b   : > { %545 = vmatpush.msra.mxu2 %v474_v52  ;;  %465 = vmatpush.msra.mxu1 %v438_v63  ;;  %v724_v22 = vld [vmem:[#allocation10 + $0x2e0] sm:$0xff]  ;;  %v693_v26 = vld [vmem:[#allocation10 + $0x1e8] sm:$0xff]  ;;  %v526_v27 = vperm.slane %v1766_v20, 2  ;;  %v524_v33 = vperm.slane %v1766_v20, 0  ;;  %v758_v63 = vld [vmem:[#allocation10 + $0x3f0] sm:$0xff] }
  0x6c   : > { %546 = vmatmul.f32.vlgmr.msra.gmra.mxu2 %v408_v54  ;;  %584 = vmatpush.msrb.mxu0 %v479_v55  ;;  %v692_v24 = vld [vmem:[#allocation10 + $0x1e0] sm:$0xff]  ;;  %v721_v28 = vld [vmem:[#allocation10 + $0x2c8] sm:$0xff] }
  0x6d   : > { %564 = vmatpush.msra.mxu3 %v478_v56  ;;  %466 = vmatpush.msra.mxu1 %v437_v0  ;;  %v720_v25 = vld [vmem:[#allocation10 + $0x2c0] sm:$0xff]  ;;  %v689_v30 = vld [vmem:[#allocation10 + $0x1c8] sm:$0xff]  ;;  %v759_v0 = vld [vmem:[#allocation10 + $0x3f8] sm:$0xff] }
  0x6e   : > { %585 = vmatpush.msrb.mxu0 %v476_v58  ;;  %790 = vmatpush.msrb.mxu2 %v756_v4  ;;  %v688_v29 = vld [vmem:[#allocation10 + $0x1c0] sm:$0xff]  ;;  %v685_v32 = vld [vmem:[#allocation10 + $0x1a8] sm:$0xff]  ;;  %v754_v4 = vld [vmem:[#allocation10 + $0x3d0] sm:$0xff] }
  0x6f   : > { %586 = vmatmul.f32.vlgmr.msrb.gmra.mxu0 %v408_v54  ;;  %565 = vmatpush.msra.mxu3 %v475_v59  ;;  %v684_v31 = vld [vmem:[#allocation10 + $0x1a0] sm:$0xff]  ;;  %v717_v35 = vld [vmem:[#allocation10 + $0x2a8] sm:$0xff] }
  0x70   : > { %566 = vmatmul.f32.vlgmr.msra.gmra.mxu3 %v408_v54  ;;  %467 = vmatpush.msra.mxu1 %v436_v1  ;;  %v716_v34 = vld [vmem:[#allocation10 + $0x2a0] sm:$0xff]  ;;  %v681_v39 = vld [vmem:[#allocation10 + $0x188] sm:$0xff] }
  0x71   : > { %830 = vmatpush.msra.mxu0 %v757_v5  ;;  %791 = vmatpush.msrb.mxu2 %v752_v6  ;;  %v680_v38 = vld [vmem:[#allocation10 + $0x180] sm:$0xff]  ;;  %v713_v41 = vld [vmem:[#allocation10 + $0x288] sm:$0xff]  ;;  %v755_v5 = vld [vmem:[#allocation10 + $0x3d8] sm:$0xff] }
  0x72   : > { %468 = vmatpush.msra.mxu1 %v435_v2  ;;  %810 = vmatpush.msrb.mxu3 %v693_v26  ;;  %v712_v40 = vld [vmem:[#allocation10 + $0x280] sm:$0xff]  ;;  %v677_v45 = vld [vmem:[#allocation10 + $0x168] sm:$0xff] }
  0x73   : > { %831 = vmatpush.msra.mxu0 %v753_v7  ;;  %792 = vmatpush.msrb.mxu2 %v748_v8  ;;  %v676_v44 = vld [vmem:[#allocation10 + $0x160] sm:$0xff]  ;;  %v709_v48 = vld [vmem:[#allocation10 + $0x268] sm:$0xff] }
  0x74   : > { %469 = vmatpush.msra.mxu1 %v434_v3  ;;  %811 = vmatpush.msrb.mxu3 %v689_v30  ;;  %v708_v47 = vld [vmem:[#allocation10 + $0x260] sm:$0xff]  ;;  %v673_v50 = vld [vmem:[#allocation10 + $0x148] sm:$0xff] }
  0x75   : > { %832 = vmatpush.msra.mxu0 %v749_v9  ;;  %793 = vmatpush.msrb.mxu2 %v744_v10  ;;  %v672_v49 = vld [vmem:[#allocation10 + $0x140] sm:$0xff]  ;;  %v705_v53 = vld [vmem:[#allocation10 + $0x248] sm:$0xff]  ;;  %v750_v10 = vld [vmem:[#allocation10 + $0x3b0] sm:$0xff] }
  0x76   : > { %770 = vmatpush.msrb.mxu1 %v692_v24  ;;  %812 = vmatpush.msrb.mxu3 %v685_v32  ;;  %v704_v52 = vld [vmem:[#allocation10 + $0x240] sm:$0xff]  ;;  %v669_v55 = vld [vmem:[#allocation10 + $0x128] sm:$0xff]  ;;  %v734_v32 = vld [vmem:[#allocation10 + $0x330] sm:$0xff] }
  0x77   : > { %833 = vmatpush.msra.mxu0 %v745_v11  ;;  %794 = vmatpush.msrb.mxu2 %v740_v12  ;;  %v668_v54 = vld [vmem:[#allocation10 + $0x120] sm:$0xff]  ;;  %v701_v57 = vld [vmem:[#allocation10 + $0x228] sm:$0xff]  ;;  %v751_v11 = vld [vmem:[#allocation10 + $0x3b8] sm:$0xff] }
  0x78   : > { %771 = vmatpush.msrb.mxu1 %v688_v29  ;;  %813 = vmatpush.msrb.mxu3 %v681_v39  ;;  %v700_v56 = vld [vmem:[#allocation10 + $0x220] sm:$0xff]  ;;  %v665_v59 = vld [vmem:[#allocation10 + $0x108] sm:$0xff]  ;;  %v730_v39 = vld [vmem:[#allocation10 + $0x310] sm:$0xff] }
  0x79   : > { %834 = vmatpush.msra.mxu0 %v741_v13  ;;  %795 = vmatpush.msrb.mxu2 %v736_v14  ;;  %v664_v58 = vld [vmem:[#allocation10 + $0x100] sm:$0xff]  ;;  %v697_v61 = vld [vmem:[#allocation10 + $0x208] sm:$0xff]  ;;  %v525_v14 = vperm.slane %v1766_v20, 1 }
  0x7a   : > { %772 = vmatpush.msrb.mxu1 %v684_v31  ;;  %814 = vmatpush.msrb.mxu3 %v677_v45  ;;  %v696_v60 = vld [vmem:[#allocation10 + $0x200] sm:$0xff]  ;;  %v661_v3 = vld [vmem:[#allocation10 + $0xe8] sm:$0xff]  ;;  %v726_v45 = vld [vmem:[#allocation10 + $0x2f0] sm:$0xff] }
  0x7b   : > { %835 = vmatpush.msra.mxu0 %v737_v15  ;;  %796 = vmatpush.msrb.mxu2 %v732_v17  ;;  %v660_v2 = vld [vmem:[#allocation10 + $0xe0] sm:$0xff]  ;;  %v657_v8 = vld [vmem:[#allocation10 + $0xc8] sm:$0xff]  ;;  %v746_v15 = vld [vmem:[#allocation10 + $0x390] sm:$0xff] }
  0x7c   : > { %773 = vmatpush.msrb.mxu1 %v680_v38  ;;  %815 = vmatpush.msrb.mxu3 %v673_v50  ;;  %v656_v7 = vld [vmem:[#allocation10 + $0xc0] sm:$0xff]  ;;  %v653_v13 = vld [vmem:[#allocation10 + $0xa8] sm:$0xff] }
  0x7d   : > { %836 = vmatpush.msra.mxu0 %v733_v18  ;;  %797 = vmatpush.msrb.mxu2 %v728_v19  ;;  %v652_v12 = vld [vmem:[#allocation10 + $0xa0] sm:$0xff]  ;;  %v649_v19 = vld [vmem:[#allocation10 + $0x88] sm:$0xff] }
  0x7e   : > { %774 = vmatpush.msrb.mxu1 %v676_v44  ;;  %816 = vmatpush.msrb.mxu3 %v669_v55  ;;  %v648_v18 = vld [vmem:[#allocation10 + $0x80] sm:$0xff]  ;;  %v641_v30 = vld [vmem:[#allocation10 + $0x48] sm:$0xff] }
  0x7f   : > { %837 = vmatpush.msra.mxu0 %v729_v21  ;;  %798 = vmatpush.msrb.mxu2 %v724_v22  ;;  %v742_v21 = vld [vmem:[#allocation10 + $0x370] sm:$0xff]  ;;  %v743_v22 = vld [vmem:[#allocation10 + $0x378] sm:$0xff]  ;;  %v644_v24 = vld [vmem:[#allocation10 + $0x60] sm:$0xff] }
  0x80   : > { %775 = vmatpush.msrb.mxu1 %v672_v49  ;;  %817 = vmatpush.msrb.mxu3 %v665_v59  ;;  %v640_v29 = vld [vmem:[#allocation10 + $0x40] sm:$0xff]  ;;  %v633_v44 = vld [vmem:[#allocation10 + $0x8] sm:$0xff]  ;;  %v695_v49 = vld [vmem:[#allocation10 + $0x1f8] sm:$0xff] }
  0x81   : > { %838 = vmatpush.msra.mxu0 %v725_v23  ;;  %799 = vmatpush.msrb.mxu2 %v720_v25  ;;  %v645_v25 = vld [vmem:[#allocation10 + $0x68] sm:$0xff] }
  0x82   : > { %776 = vmatpush.msrb.mxu1 %v668_v54  ;;  %818 = vmatpush.msrb.mxu3 %v661_v3 }
  0x83   : > { %839 = vmatpush.msra.mxu0 %v721_v28  ;;  %800 = vmatpush.msrb.mxu2 %v716_v34  ;;  %v739_v28 = vld [vmem:[#allocation10 + $0x358] sm:$0xff] }
  0x84   : > { %777 = vmatpush.msrb.mxu1 %v664_v58  ;;  %819 = vmatpush.msrb.mxu3 %v657_v8  ;;  %v691_v58 = vld [vmem:[#allocation10 + $0x1d8] sm:$0xff] }
  0x85   : > { %840 = vmatpush.msra.mxu0 %v717_v35  ;;  %801 = vmatpush.msrb.mxu2 %v712_v40  ;;  %v636_v35 = vld [vmem:[#allocation10 + $0x20] sm:$0xff]  ;;  %v731_v40 = vld [vmem:[#allocation10 + $0x318] sm:$0xff] }
  0x86   : > { %778 = vmatpush.msrb.mxu1 %v660_v2  ;;  %820 = vmatpush.msrb.mxu3 %v653_v13  ;;  %v687_v2 = vld [vmem:[#allocation10 + $0x1b8] sm:$0xff] }
  0x87   : > { %841 = vmatpush.msra.mxu0 %v713_v41  ;;  %802 = vmatpush.msrb.mxu2 %v708_v47  ;;  %v711_v13 = vld [vmem:[#allocation10 + $0x278] sm:$0xff] }
  0x88   : > { %779 = vmatpush.msrb.mxu1 %v656_v7  ;;  %821 = vmatpush.msrb.mxu3 %v649_v19  ;;  %v674_v19 = vld [vmem:[#allocation10 + $0x150] sm:$0xff] }
  0x89   : > { %842 = vmatpush.msra.mxu0 %v709_v48  ;;  %803 = vmatpush.msrb.mxu2 %v704_v52  ;;  %v694_v48 = vld [vmem:[#allocation10 + $0x1f0] sm:$0xff] }
  0x8a   : > { %780 = vmatpush.msrb.mxu1 %v652_v12  ;;  %822 = vmatpush.msrb.mxu3 %v645_v25  ;;  %v722_v52 = vld [vmem:[#allocation10 + $0x2d0] sm:$0xff] }
  0x8b   : > { %843 = vmatpush.msra.mxu0 %v705_v53  ;;  %804 = vmatpush.msrb.mxu2 %v700_v56  ;;  %v723_v53 = vld [vmem:[#allocation10 + $0x2d8] sm:$0xff]  ;;  %v710_v12 = vld [vmem:[#allocation10 + $0x270] sm:$0xff] }
  0x8c   : > { %781 = vmatpush.msrb.mxu1 %v648_v18  ;;  %823 = vmatpush.msrb.mxu3 %v641_v30  ;;  %v707_v18 = vld [vmem:[#allocation10 + $0x258] sm:$0xff]  ;;  %v666_v30 = vld [vmem:[#allocation10 + $0x110] sm:$0xff] }
  0x8d   : > { %844 = vmatpush.msra.mxu0 %v701_v57  ;;  %805 = vmatpush.msrb.mxu2 %v696_v60  ;;  %v690_v57 = vld [vmem:[#allocation10 + $0x1d0] sm:$0xff] }
  0x8e   : > { %782 = vmatpush.msrb.mxu1 %v644_v24  ;;  %v718_v60 = vld [vmem:[#allocation10 + $0x2b0] sm:$0xff]  ;;  %v703_v24 = vld [vmem:[#allocation10 + $0x238] sm:$0xff] }
  0x8f   : > { %845 = vmatpush.msra.mxu0 %v697_v61  ;;  %870 = vmatpush.msra.mxu2 %v758_v63  ;;  %v719_v61 = vld [vmem:[#allocation10 + $0x2b8] sm:$0xff] }
  0x90   : > { %783 = vmatpush.msrb.mxu1 %v640_v29 }
  0x91   : > { %910 = vmatpush.msrb.mxu0 %v759_v0  ;;  %871 = vmatpush.msra.mxu2 %v754_v4  ;;  %v686_v0 = vld [vmem:[#allocation10 + $0x1b0] sm:$0xff] }
  0x92   : > { %784 = vmatpush.msrb.mxu1 %v636_v35  ;;  %v714_v4 = vld [vmem:[#allocation10 + $0x290] sm:$0xff]  ;;  %v659_v35 = vld [vmem:[#allocation10 + $0xd8] sm:$0xff] }
  0x93   : > { %911 = vmatpush.msrb.mxu0 %v755_v5  ;;  %872 = vmatpush.msra.mxu2 %v750_v10  ;;  %v715_v5 = vld [vmem:[#allocation10 + $0x298] sm:$0xff]  ;;  %v682_v10 = vld [vmem:[#allocation10 + $0x190] sm:$0xff] }
  0x95   : > { %912 = vmatpush.msrb.mxu0 %v751_v11  ;;  %873 = vmatpush.msra.mxu2 %v746_v15  ;;  %v683_v11 = vld [vmem:[#allocation10 + $0x198] sm:$0xff]  ;;  %v678_v15 = vld [vmem:[#allocation10 + $0x170] sm:$0xff] }
  0x97   : > { %874 = vmatpush.msra.mxu2 %v742_v21  ;;  %v675_v21 = vld [vmem:[#allocation10 + $0x158] sm:$0xff] }
  0xcc   : > { %v431_v16 = vpop.f32.mrf.mxu0 }
  0xcd   : > { %470 = vmatmul.f32.vlgmr.msra.gmra.mxu1 %v431_v16  ;;  %v747_v16 = vld [vmem:[#allocation10 + $0x398] sm:$0xff] }
  0xce   : > { %913 = vmatpush.msrb.mxu0 %v747_v16  ;;  %v679_v16 = vld [vmem:[#allocation10 + $0x178] sm:$0xff] }
  0xd0   : > { %914 = vmatpush.msrb.mxu0 %v743_v22  ;;  %v702_v22 = vld [vmem:[#allocation10 + $0x230] sm:$0xff] }
  0xd2   : > { %915 = vmatpush.msrb.mxu0 %v739_v28 }
  0xec   : > { %v587_v36 = vpop.f32.mrf.mxu0 }
  0xed   : > { %v588_v37 = vadd.f32 %v587_v36, %v526_v27  ;;  %v738_v27 = vld [vmem:[#allocation10 + $0x350] sm:$0xff]  ;;  %v637_v36 = vld [vmem:[#allocation10 + $0x28] sm:$0xff] }
  0xee   : > { %875 = vmatpush.msra.mxu2 %v738_v27  ;;  %824 = vmatpush.msrb.mxu3 %v637_v36  ;;  %v699_v27 = vld [vmem:[#allocation10 + $0x218] sm:$0xff]  ;;  %v654_v36 = vld [vmem:[#allocation10 + $0xb0] sm:$0xff] }
  0xef   : > { %v547_v42 = vpop.f32.mrf.mxu2  ;;  %v1153_v43 = vmul.f32 -1.442695, %v588_v37 }
  0xf0   : > { %v548_v46 = vadd.f32 %v547_v42, %v524_v33  ;;  %v735_v33 = vld [vmem:[#allocation10 + $0x338] sm:$0xff]  ;;  %876 = vmatpush.msra.mxu2 %v734_v32  ;;  %825 = vmatpush.msrb.mxu3 %v633_v44  ;;  %v662_v32 = vld [vmem:[#allocation10 + $0xf0] sm:$0xff] }
  0xf1   : > { %1265 = vpow2.f32 %v1153_v43  ;;  %916 = vmatpush.msrb.mxu0 %v735_v33  ;;  %v632_v43 = vld [vmem:[#allocation10] sm:$0xff]  ;;  %v663_v33 = vld [vmem:[#allocation10 + $0xf8] sm:$0xff]  ;;  %v638_v44 = vld [vmem:[#allocation10 + $0x30] sm:$0xff] }
  0xf2   : > { %v1152_v51 = vmul.f32 -1.442695, %v548_v46  ;;  %v727_v46 = vld [vmem:[#allocation10 + $0x2f8] sm:$0xff]  ;;  %877 = vmatpush.msra.mxu2 %v730_v39  ;;  %785 = vmatpush.msrb.mxu1 %v632_v43 }
  0xf3   : > { %v567_v17 = vpop.f32.mrf.mxu3  ;;  %917 = vmatpush.msrb.mxu0 %v731_v40  ;;  %890 = vmatpush.msra.mxu3 %v695_v49  ;;  %v651_v39 = vld [vmem:[#allocation10 + $0x98] sm:$0xff]  ;;  %v646_v40 = vld [vmem:[#allocation10 + $0x70] sm:$0xff] }
  0xf4   : > { %1267 = vpow2.f32 %v1152_v51  ;;  %v568_v26 = vadd.f32 %v567_v17, %v525_v14  ;;  %878 = vmatpush.msra.mxu2 %v726_v45  ;;  %850 = vmatpush.msra.mxu1 %v694_v48  ;;  %v706_v17 = vld [vmem:[#allocation10 + $0x250] sm:$0xff]  ;;  %v643_v43 = vld [vmem:[#allocation10 + $0x58] sm:$0xff]  ;;  %v1264_v48 = vld [vmem:[%s1866_s3] ss:$0 sm:$0xff] }
  0xf5   : > { %918 = vmatpush.msrb.mxu0 %v727_v46  ;;  %891 = vmatpush.msra.mxu3 %v691_v58  ;;  %v639_v45 = vld [vmem:[#allocation10 + $0x38] sm:$0xff]  ;;  %v634_v46 = vld [vmem:[#allocation10 + $0x10] sm:$0xff] }
  0xf6   : > { %879 = vmatpush.msra.mxu2 %v722_v52  ;;  %851 = vmatpush.msra.mxu1 %v690_v57 }
  0xf7   : > { %v1266_v62 = vpop.eup %1265  ;;  %919 = vmatpush.msrb.mxu0 %v723_v53  ;;  %892 = vmatpush.msra.mxu3 %v687_v2 }
  0xf8   : > { %v1770_v1 = vadd.f32 1.0, %v1266_v62  ;;  %880 = vmatpush.msra.mxu2 %v718_v60  ;;  %852 = vmatpush.msra.mxu1 %v686_v0 }
  0xf9   : > { %920 = vmatpush.msrb.mxu0 %v719_v61  ;;  %893 = vmatpush.msra.mxu3 %v683_v11 }
  0xfa   : > { %v1268_v6 = vpop.eup %1267  ;;  %1269 = vrcp.f32 %v1770_v1  ;;  %vm619_vm5 = vweird.f32 %v1770_v1  ;;  %v625_v63 = vand.u32 2147483648, %v1770_v1  ;;  %v623_v7 = vand.u32 2147483647, %v1770_v1  ;;  %881 = vmatpush.msra.mxu2 %v714_v4  ;;  %853 = vmatpush.msra.mxu1 %v682_v10 }
  0xfb   : > { %v1773_v9 = vadd.f32 1.0, %v1268_v6  ;;  %921 = vmatpush.msrb.mxu0 %v715_v5  ;;  %894 = vmatpush.msra.mxu3 %v679_v16 }
  0xfc   : > { %v626_v14 = vor.u32 1.1754944e-38, %v625_v63  ;;  %vm624_vm8 = vcmp.eq.f32.partialorder %v623_v7, 8.507059e+37  ;;  %882 = vmatpush.msra.mxu2 %v710_v12  ;;  %854 = vmatpush.msra.mxu1 %v678_v15 }
  0xfd   : > { %1271 = vrcp.f32 %v1773_v9  ;;  %v605_v38 = vand.u32 2147483648, %v1773_v9  ;;  %vm599_vm1 = vweird.f32 %v1773_v9  ;;  %v603_v42 = vand.u32 2147483647, %v1773_v9  ;;  %922 = vmatpush.msrb.mxu0 %v711_v13  ;;  %895 = vmatpush.msra.mxu3 %v675_v21 }
  0xfe   : > { %1273 = vtanh.f32 %v568_v26  ;;  %883 = vmatpush.msra.mxu2 %v706_v17  ;;  %v671_v26 = vld [vmem:[#allocation10 + $0x138] sm:$0xff]  ;;  %855 = vmatpush.msra.mxu1 %v674_v19 }
  0xff   : > { %v606_v51 = vor.u32 1.1754944e-38, %v605_v38  ;;  %vm1793_vm4 = vcmp.eq.f32.partialorder %v603_v42, 8.507059e+37  ;;  %923 = vmatpush.msrb.mxu0 %v707_v18  ;;  %896 = vmatpush.msra.mxu3 %v671_v26  ;;  %v650_v38 = vld [vmem:[#allocation10 + $0x90] sm:$0xff] }
 0x100   : > { %v1777_v23 = vpop.eup %1269  ;;  %884 = vmatpush.msra.mxu2 %v702_v22  ;;  %v642_v42 = vld [vmem:[#allocation10 + $0x50] sm:$0xff] }
 0x101   : > { %v615_v20 = vmul.f32 %v1777_v23, %v1770_v1  ;;  %vm620_vm6 = vweird.f32 %v1777_v23  ;;  %924 = vmatpush.msrb.mxu0 %v703_v24 }
 0x102   : > { %vm1812_vm7 = vmor %vm619_vm5, %vm620_vm6 }
 0x103   : > { %v1272_v31 = vpop.eup %1271  ;;  %v616_v37 = vsub.f32 1.0, %v615_v20  ;;  %v670_v20 = vld [vmem:[#allocation10 + $0x130] sm:$0xff]  ;;  %925 = vmatpush.msrb.mxu0 %v699_v27 }
 0x104   : > { %v595_v34 = vmul.f32 %v1272_v31, %v1773_v9  ;;  %vm600_vm2 = vweird.f32 %v1272_v31  ;;  %v1274_v59 = vpop.eup %1273  ;;  %856 = vmatpush.msra.mxu1 %v670_v20 }
 0x105   : > { %vm1788_vm3 = vmor %vm599_vm1, %vm600_vm2  ;;  %v617_v54 = vmul.f32 %v1777_v23, %v616_v37  ;;  %v655_v37 = vld [vmem:[#allocation10 + $0xb8] sm:$0xff] }
 0x106   : > { %v596_v41 = vsub.f32 1.0, %v595_v34  ;;  %857 = vmatpush.msra.mxu1 %v666_v30  ;;  %v658_v34 = vld [vmem:[#allocation10 + $0xd0] sm:$0xff] }
 0x107   : > { %v618_v6 = vadd.f32 %v1777_v23, %v617_v54 }
 0x108   : > { %v597_v47 = vmul.f32 %v1272_v31, %v596_v41  ;;  %858 = vmatpush.msra.mxu1 %v662_v32  ;;  %v647_v41 = vld [vmem:[#allocation10 + $0x78] sm:$0xff] }
 0x109   : > { %v622_v1 = vsel %vm1812_vm7, %v1777_v23, %v618_v6  ;;  %v698_v23 = vld [vmem:[#allocation10 + $0x210] sm:$0xff] }
 0x10a   : > { %v598_v55 = vadd.f32 %v1272_v31, %v597_v47  ;;  %v627_v25 = vsel %vm624_vm8, %v626_v14, %v622_v1  ;;  %885 = vmatpush.msra.mxu2 %v698_v23  ;;  %859 = vmatpush.msra.mxu1 %v658_v34  ;;  %v635_v47 = vld [vmem:[#allocation10 + $0x18] sm:$0xff] }
 0x10c   : > { %v602_v62 = vsel %vm1788_vm3, %v1272_v31, %v598_v55  ;;  %v667_v31 = vld [vmem:[#allocation10 + $0x118] sm:$0xff]  ;;  %860 = vmatpush.msra.mxu1 %v654_v36 }
 0x10d   : > { %v607_v3 = vsel %vm1793_vm4, %v606_v51, %v602_v62  ;;  %897 = vmatpush.msra.mxu3 %v667_v31  ;;  %v760_v51 = vld [vmem:[%s1869_s6] sm:$0xf] }
 0x10e   : > { %v1806_v8 = vmul.f32 %v1274_v59, %v607_v3  ;;  %861 = vmatpush.msra.mxu1 %v650_v38  ;;  %v762_v52 = vperm.slane %v760_v51, 0  ;;  %v763_v57 = vperm.slane %v760_v51, 1  ;;  %v765_v0 = vperm.slane %v760_v51, 3 }
 0x10f   : > { %898 = vmatpush.msra.mxu3 %v663_v33  ;;  %v764_v12 = vperm.slane %v760_v51, 2 }
 0x110   : > { %1275 = vtanh.f32 %v1806_v8  ;;  %862 = vmatpush.msra.mxu1 %v646_v40 }
 0x111   : > { %899 = vmatpush.msra.mxu3 %v659_v35 }
 0x112   : > { %863 = vmatpush.msra.mxu1 %v642_v42 }
 0x113   : > { %900 = vmatpush.msra.mxu3 %v655_v37 }
 0x114   : > { %864 = vmatpush.msra.mxu1 %v638_v44 }
 0x115   : > { %901 = vmatpush.msra.mxu3 %v651_v39 }
 0x116   : > { %v1276_v28 = vpop.eup %1275  ;;  %865 = vmatpush.msra.mxu1 %v634_v46 }
 0x117   : > { %v631_v29 = vmul.f32 %v1276_v28, %v627_v25  ;;  %902 = vmatpush.msra.mxu3 %v647_v41 }
 0x119   : > { %806 = vmatmul.f32.vlgmr.msrb.gmra.mxu2 %v631_v29  ;;  %846 = vmatmul.f32.vlgmr.msra.gmra.mxu0 %v631_v29 }
 0x11a   : > { %903 = vmatpush.msra.mxu3 %v643_v43 }
 0x11c   : > { %904 = vmatpush.msra.mxu3 %v639_v45 }
 0x11e   : > { %905 = vmatpush.msra.mxu3 %v635_v47 }
 0x121   : > { %886 = vmatmul.f32.vlgmr.msra.gmra.mxu2 %v631_v29  ;;  %926 = vmatmul.f32.vlgmr.msrb.gmra.mxu0 %v631_v29 }
 0x14a   : > { %v471_v49 = vpop.f32.mrf.mxu1 }
 0x14b   : > { %v472_v50 = vadd.f32 %v1264_v48, %v471_v49 }
 0x14d   : > { %786 = vmatmul.f32.vlgmr.msrb.gmra.mxu1 %v472_v50  ;;  %826 = vmatmul.f32.vlgmr.msrb.gmra.mxu3 %v472_v50 }
 0x155   : > { %866 = vmatmul.f32.vlgmr.msra.gmra.mxu1 %v472_v50  ;;  %906 = vmatmul.f32.vlgmr.msra.gmra.mxu3 %v472_v50 }
 0x196   : > { %v847_v59 = vpop.f32.mrf.mxu0 }
 0x19c   : > { %v807_v55 = vpop.f32.mrf.mxu2 }
 0x19e   : > { %v927_v6 = vpop.f32.mrf.mxu0 }
 0x1a4   : > { %v887_v18 = vpop.f32.mrf.mxu2 }
 0x1ca   : > { %v787_v53 = vpop.f32.mrf.mxu1 }
 0x1cb   : > { %v788_v54 = vadd.f32 %v787_v53, %v762_v52 }
 0x1cd   : > { %v808_v56 = vadd.f32 %v807_v55, %v788_v54 }
 0x1cf   : > { %v1154_v58 = vmul.f32 -1.442695, %v808_v56 }
 0x1d0   : > { %v827_v60 = vpop.f32.mrf.mxu3 }
 0x1d1   : > { %1277 = vpow2.f32 %v1154_v58  ;;  %v828_v61 = vadd.f32 %v827_v60, %v763_v57 }
 0x1d2   : > { %v867_v13 = vpop.f32.mrf.mxu1 }
 0x1d3   : > { %v848_v62 = vadd.f32 %v847_v59, %v828_v61  ;;  %v868_v16 = vadd.f32 %v867_v13, %v764_v12 }
 0x1d5   : > { %v1155_v63 = vmul.f32 -1.442695, %v848_v62  ;;  %v888_v22 = vadd.f32 %v887_v18, %v868_v16 }
 0x1d7   : > { %v1278_v2 = vpop.eup %1277  ;;  %1279 = vpow2.f32 %v1155_v63 }
 0x1d8   : > { %v933_v3 = vadd.f32 1.0, %v1278_v2  ;;  %v907_v4 = vpop.f32.mrf.mxu3 }
 0x1d9   : > { %v908_v5 = vadd.f32 %v907_v4, %v765_v0 }
 0x1da   : > { %1281 = vrcp.f32 %v933_v3  ;;  %v945_v26 = vand.u32 2147483648, %v933_v3  ;;  %vm939_vm10 = vweird.f32 %v933_v3  ;;  %v943_v27 = vand.u32 2147483647, %v933_v3 }
 0x1db   : > { %v928_v7 = vadd.f32 %v927_v6, %v908_v5 }
 0x1dc   : > { %v946_v32 = vor.u32 1.1754944e-38, %v945_v26  ;;  %vm944_vm14 = vcmp.eq.f32.partialorder %v943_v27, 8.507059e+37 }
 0x1dd   : > { %v1280_v9 = vpop.eup %1279  ;;  %v1156_v10 = vmul.f32 -1.442695, %v928_v7 }
 0x1de   : > { %v952_v11 = vadd.f32 1.0, %v1280_v9 }
 0x1df   : > { %1283 = vpow2.f32 %v1156_v10 }
 0x1e0   : > { %v1282_v14 = vpop.eup %1281  ;;  %1285 = vrcp.f32 %v952_v11  ;;  %v964_v28 = vand.u32 2147483648, %v952_v11  ;;  %v962_v31 = vand.u32 2147483647, %v952_v11  ;;  %vm958_vm13 = vweird.f32 %v952_v11 }
 0x1e1   : > { %v935_v15 = vmul.f32 %v1282_v14, %v933_v3  ;;  %vm940_vm9 = vweird.f32 %v1282_v14 }
 0x1e2   : > { %vm941_vm11 = vmor %vm939_vm10, %vm940_vm9  ;;  %v965_v35 = vor.u32 1.1754944e-38, %v964_v28  ;;  %vm963_vm0 = vcmp.eq.f32.partialorder %v962_v31, 8.507059e+37 }
 0x1e3   : > { %v936_v1 = vsub.f32 1.0, %v935_v15 }
 0x1e5   : > { %v1284_v17 = vpop.eup %1283  ;;  %v937_v19 = vmul.f32 %v1282_v14, %v936_v1 }
 0x1e6   : > { %v1286_v21 = vpop.eup %1285  ;;  %v972_v24 = vadd.f32 1.0, %v1284_v17 }
 0x1e7   : > { %v954_v25 = vmul.f32 %v1286_v21, %v952_v11  ;;  %v938_v20 = vadd.f32 %v1282_v14, %v937_v19  ;;  %vm959_vm12 = vweird.f32 %v1286_v21 }
 0x1e8   : > { %1287 = vrcp.f32 %v972_v24  ;;  %vm960_vm15 = vmor %vm958_vm13, %vm959_vm12  ;;  %v984_v47 = vand.u32 2147483648, %v972_v24  ;;  %vm978_vm2 = vweird.f32 %v972_v24  ;;  %v982_v48 = vand.u32 2147483647, %v972_v24 }
 0x1e9   : > { %v955_v23 = vsub.f32 1.0, %v954_v25  ;;  %1289 = vtanh.f32 %v888_v22  ;;  %v942_v30 = vsel %vm941_vm11, %v1282_v14, %v938_v20 }
 0x1ea   : > { %v947_v36 = vsel %vm944_vm14, %v946_v32, %v942_v30  ;;  %v985_v49 = vor.u32 1.1754944e-38, %v984_v47  ;;  %vm983_vm4 = vcmp.eq.f32.partialorder %v982_v48, 8.507059e+37 }
 0x1eb   : > { %v956_v29 = vmul.f32 %v1286_v21, %v955_v23 }
 0x1ed   : > { %v957_v33 = vadd.f32 %v1286_v21, %v956_v29 }
 0x1ee   : > { %v1288_v34 = vpop.eup %1287 }
 0x1ef   : > { %v961_v37 = vsel %vm960_vm15, %v1286_v21, %v957_v33  ;;  %v974_v38 = vmul.f32 %v1288_v34, %v972_v24  ;;  %v1290_v39 = vpop.eup %1289  ;;  %vm979_vm1 = vweird.f32 %v1288_v34 }
 0x1f0   : > { %v966_v40 = vsel %vm963_vm0, %v965_v35, %v961_v37  ;;  %v989_v42 = vmul.f32 %v1290_v39, %v947_v36  ;;  %vm980_vm3 = vmor %vm978_vm2, %vm979_vm1 }
 0x1f1   : > { %v988_v41 = vmul.f32 %v966_v40, %v1806_v8  ;;  %v975_v43 = vsub.f32 1.0, %v974_v38 }
 0x1f3   : > { %v990_v44 = vadd.f32 %v989_v42, %v988_v41  ;;  %v976_v45 = vmul.f32 %v1288_v34, %v975_v43 }
 0x1f5   : > { %1291 = vtanh.f32 %v990_v44  ;;  %v977_v46 = vadd.f32 %v1288_v34, %v976_v45 }
 0x1f7   : > { %v981_v8 = vsel %vm980_vm3, %v1288_v34, %v977_v46 }
 0x1f8   : > { %v986_v51 = vsel %vm983_vm4, %v985_v49, %v981_v8 }
 0x1fb   : > { %v1292_v50 = vpop.eup %1291 }
 0x1fc   : > { %v992_v52 = vmul.f32 %v1292_v50, %v986_v51 }
 0x1fe   : > { %993 = vst [vmem:[%s403_s22] sm:$0xff] %v992_v52 }
 0x1ff   : > { %1500 = shalt.err (!%p1497_p9)
}
 0x200   : > { %1183 = dma.vmem_to_hbm [thread:$0]  (%p1703_p0), %s1008_s19, 128, %s1010_s26, %s995_s9  }
 0x201 PF: > { %s1021_s5 = sand.u32 1, %s1543_s27   ;;  %p1893_p10 = scmp.ge.s32.totalorder %s1555_s30, 2 }
 0x202   : > { %s1022_s10 = scalar_lea.sflag [#allocation4], %s1021_s5 }
 0x203   : > { %p1206_p11 = pnand %p1893_p10, %p1709_p6 }
 0x205   : > { %p1207_p12 = pneg %p1206_p11 }
 0x207   : > { %1538 = dma.done.wait (%p1207_p12), %s1022_s10, 128  }
 0x208   : > { %1540 = vsyncadd (%p1207_p12), %s1022_s10, 4294967168  ;;  %p24_p2 = scmp.ge.s32.totalorder %s1679_s14, 4   ;;  %s1894_s27 = smov %s1547_s28 }
 0x209   : > { %s1895_s28 = smov %s1551_s29  ;;  %s1896_s29 = smov %s1691_s20 }
 0x20a   : > { %s1897_s30 = smov %s1679_s14  ;;  %26 = sbr.rel (!%p24_p2) target bundleno = 13 (0xd), region = 119 }
 0x20f   :  { %1028 = vsyncpa [#allocation3], 1 }
 0x210   :  { %1030 = vsyncpa [#allocation3 + $0x1], 1 }
 0x211   :  { %1031 = vsyncpa [#allocation6], 1 }
 0x212   :  { %1033 = vsyncpa [#allocation6 + $0x1], 1 }
 0x213   :  { %1034 = vsyncpa [#allocation9], 1 }
 0x214   :  { %1035 = vsyncpa [#allocation12], 1 }
 0x215   :  { %1036 = vsyncpa [#allocation4], 1 }
 0x216   :  { %1038 = vsyncpa [#allocation4 + $0x1], 1 }

</bundles_post_ra>
